<compile_context>
chip_gen: v7x
topology: tpu7x:2x2x1
jax: 0.10.0
libtpu: 0.0.40
codegen_flags: <defaults>
</compile_context>

<pallas_src>
import functools
import math

import jax
import jax.numpy as jnp
from jax import lax
from jax.experimental import pallas as pl
from jax.experimental.pallas import tpu as pltpu

OMEGA = 10.0
EPSILON = 2.0
INV_EPSILON = 1.0 / EPSILON
C_CONST = OMEGA - OMEGA * math.log(1.0 + OMEGA / EPSILON)

_LANES = 128
_SUBLANES = 8
_MAX_BLOCK_ROWS = 4096  # 4096 * 128 * 4B = 2 MiB per f32 input tile


def _wing_loss_kernel(pred_ref, target_ref, out_ref, *,
                      total_rows, block_rows, need_mask):
    # Cast in-kernel (handles bf16 inputs without a wrapper-side HBM copy).
    p = pred_ref[...].astype(jnp.float32)
    t = target_ref[...].astype(jnp.float32)

    delta = jnp.abs(t - p)
    # Piecewise wing loss (select-based, equivalent to the boolean-mask split
    # in the PyTorch module).  Zero-padded tail lanes give log1p(0) = 0.
    loss = jnp.where(
        delta < OMEGA,
        OMEGA * jnp.log1p(delta * INV_EPSILON),
        delta - C_CONST,
    )

    if need_mask:
        # Last grid block overruns the array; rows past `total_rows` hold
        # unspecified data — zero them out (select, so NaNs don't propagate).
        row0 = pl.program_id(0) * block_rows
        row_idx = lax.broadcasted_iota(jnp.int32, (block_rows, _LANES), 0)
        loss = jnp.where(row0 + row_idx < total_rows, loss, 0.0)

    # Fold (block_rows, 128) -> (8, 128) partial with pure vreg adds (VPU);
    # the cross-lane scalar reduce is deferred to the wrapper.
    partial = jnp.sum(loss.reshape(-1, _SUBLANES, _LANES), axis=0)
    out_ref[...] = partial.reshape(1, _SUBLANES, _LANES)


def wing_loss(pred: jax.Array, target: jax.Array) -> jax.Array:
    assert pred.shape == target.shape
    n_elem = pred.size

    p = pred.reshape(-1)
    t = target.reshape(-1)

    # Pad only to a lane multiple (zero pad -> delta = 0 -> zero contribution).
    pad = (-n_elem) % _LANES
    if pad:
        p = jnp.pad(p, (0, pad))
        t = jnp.pad(t, (0, pad))
    rows = (n_elem + pad) // _LANES

    # Large block for throughput, shrunk (to a multiple of 8 rows) for small
    # inputs so tiny tensors aren't blown up.
    block_rows = min(_MAX_BLOCK_ROWS,
                     ((rows + _SUBLANES - 1) // _SUBLANES) * _SUBLANES)
    num_blocks = pl.cdiv(rows, block_rows)
    need_mask = (num_blocks * block_rows) != rows

    p2 = p.reshape(rows, _LANES)
    t2 = t.reshape(rows, _LANES)

    kernel = functools.partial(
        _wing_loss_kernel,
        total_rows=rows,
        block_rows=block_rows,
        need_mask=need_mask,
    )

    partials = pl.pallas_call(
        kernel,
        out_shape=jax.ShapeDtypeStruct((num_blocks, _SUBLANES, _LANES),
                                       jnp.float32),
        grid_spec=pltpu.PrefetchScalarGridSpec(
            num_scalar_prefetch=0,
            grid=(num_blocks,),
            in_specs=[
                pl.BlockSpec((block_rows, _LANES), lambda i: (i, 0)),
                pl.BlockSpec((block_rows, _LANES), lambda i: (i, 0)),
            ],
            out_specs=pl.BlockSpec((1, _SUBLANES, _LANES),
                                   lambda i: (i, 0, 0)),
        ),
        compiler_params=pltpu.CompilerParams(
            dimension_semantics=("parallel",),
        ),
    )(p2, t2)

    # denominator = len(loss1) + len(loss2) = total number of elements
    return jnp.sum(partials) / jnp.float32(n_elem)


def wing_loss_ref(pred, target):
    delta = jnp.abs(target.astype(jnp.float32) - pred.astype(jnp.float32))
    loss = jnp.where(
        delta < OMEGA, OMEGA * jnp.log1p(delta / EPSILON), delta - C_CONST
    )
    return jnp.mean(loss)


if __name__ == "__main__":
    key = jax.random.PRNGKey(0)
    k1, k2 = jax.random.split(key)
    # small landmark-regression-like shapes: batch=2, channels=4, spatial=16x16
    pred = jax.random.normal(k1, (2, 4, 16, 16), dtype=jnp.float32) * 8.0
    target = jax.random.normal(k2, (2, 4, 16, 16), dtype=jnp.float32) * 8.0

    out = wing_loss(pred, target)
    out = jax.block_until_ready(out)

    ref = wing_loss_ref(pred, target)
    assert jnp.allclose(out, ref, rtol=1e-5, atol=1e-5), (out, ref)
    print("KERNEL_OK")
</pallas_src>

<mosaic_0001>
module attributes {stable_mosaic.version = 11 : i64} {
  func.func @_wing_loss_kernel(%arg0: i32, %arg1: memref<16x128xf32, #tpu.memory_space<vmem>>, %arg2: memref<16x128xf32, #tpu.memory_space<vmem>>, %arg3: memref<1x8x128xf32, #tpu.memory_space<vmem>>) attributes {dimension_semantics = [#tpu.dimension_semantics<parallel>], iteration_bounds = array<i64: 1>, scalar_prefetch = 0 : i64, scratch_operands = 0 : i64, tpu.core_type = #tpu.core_type<tc>, window_params = [{transform_indices = @transform_0, window_bounds = array<i64: 16, 128>}, {transform_indices = @transform_1, window_bounds = array<i64: 16, 128>}, {transform_indices = @transform_2, window_bounds = array<i64: 1, 8, 128>}]} {
    %c0 = arith.constant 0 : index
    %c0_0 = arith.constant 0 : index
    %0 = vector.load %arg1[%c0, %c0_0] : memref<16x128xf32, #tpu.memory_space<vmem>>, vector<16x128xf32>
    %c0_1 = arith.constant 0 : index
    %c0_2 = arith.constant 0 : index
    %1 = vector.load %arg2[%c0_1, %c0_2] : memref<16x128xf32, #tpu.memory_space<vmem>>, vector<16x128xf32>
    %2 = arith.subf %1, %0 : vector<16x128xf32>
    %3 = math.absf %2 : vector<16x128xf32>
    %cst = arith.constant 1.000000e+01 : f32
    %4 = vector.broadcast %cst : f32 to vector<16x128xf32>
    %5 = arith.cmpf olt, %3, %4 : vector<16x128xf32>
    %cst_3 = arith.constant 5.000000e-01 : f32
    %6 = vector.broadcast %cst_3 : f32 to vector<16x128xf32>
    %7 = arith.mulf %3, %6 : vector<16x128xf32>
    %8 = math.log1p %7 : vector<16x128xf32>
    %cst_4 = arith.constant 1.000000e+01 : f32
    %9 = vector.broadcast %cst_4 : f32 to vector<16x128xf32>
    %10 = arith.mulf %9, %8 : vector<16x128xf32>
    %cst_5 = arith.constant -7.9175949 : f32
    %11 = vector.broadcast %cst_5 : f32 to vector<16x128xf32>
    %12 = arith.subf %3, %11 : vector<16x128xf32>
    %13 = arith.select %5, %10, %12 : vector<16x128xi1>, vector<16x128xf32>
    %14 = vector.shape_cast %13 : vector<16x128xf32> to vector<2x8x128xf32>
    %cst_6 = arith.constant dense<0.000000e+00> : vector<8x128xf32>
    %15 = vector.multi_reduction <add>, %14, %cst_6 [0] : vector<2x8x128xf32> to vector<8x128xf32>
    %16 = vector.shape_cast %15 : vector<8x128xf32> to vector<1x8x128xf32>
    %c0_7 = arith.constant 0 : index
    %c0_8 = arith.constant 0 : index
    %c0_9 = arith.constant 0 : index
    %17 = vector.load %arg3[%c0_7, %c0_8, %c0_9] : memref<1x8x128xf32, #tpu.memory_space<vmem>>, vector<1x8x128xf32>
    tpu.vector_store %arg3[%c0_7, %c0_8, %c0_9], %16 {strides = array<i32>} : memref<1x8x128xf32, #tpu.memory_space<vmem>>, vector<1x8x128xf32>,
    return
  }
  func.func @transform_0(%arg0: i32) -> (i32, i32) {
    %c0_i32 = arith.constant 0 : i32
    %c0_i32_0 = arith.constant 0 : i32
    return %arg0, %c0_i32 : i32, i32
  }
  func.func @transform_1(%arg0: i32) -> (i32, i32) {
    %c0_i32 = arith.constant 0 : i32
    %c0_i32_0 = arith.constant 0 : i32
    return %arg0, %c0_i32 : i32, i32
  }
  func.func @transform_2(%arg0: i32) -> (i32, i32, i32) {
    %c0_i32 = arith.constant 0 : i32
    %c0_i32_0 = arith.constant 0 : i32
    %c0_i32_1 = arith.constant 0 : i32
    return %arg0, %c0_i32, %c0_i32_0 : i32, i32, i32
  }
}

</mosaic_0001>

<bundles_post_ra>
// kernel: tpu_custom_call.1
= control target key start
LH: loop header
LB: loop body
LE: loop exit
PB: predicated region body
PF: predicated region fallthrough
CT: control target
= control target key end

     0   :  { %7 = vsyncpa [#allocation3], 0  ;;  %s233_s0 = inlined_call_operand.hbm [shape: f32[16,128], index: 0, kind: input, shape index: {}]   ;;  %s234_s1 = inlined_call_operand.hbm [shape: f32[16,128], index: 1, kind: input, shape index: {}]   ;;  %s235_s2 = inlined_call_operand.hbm [shape: f32[1,8,128], index: 2, kind: output, shape index: {}]  }
   0x1   :  { %8 = vsyncpa [#allocation6], 0 }
   0x2   :  { %9 = vsyncpa [#allocation4], 0  ;;  %s177_s9 = smov [#allocation2]   ;;  %s105_s13 = scalar_lea.hbm %s233_s0, 256 }
   0x3   :  { %s15_s10 = sshll.u32 %s177_s9, 4  ;;  %p106_p0 = scmp.ne.s32.totalorder %s233_s0, %s105_s13  ;;  %s16_s10 = int_to_ptr.vmem [resolvable:$true] %s15_s10 }
   0x4   :  { %p109_p1 = scmp.lt.u32.totalorder %s105_s13, %s233_s0 }
   0x6   :  { %p111_p2 = pnand %p109_p1, %p106_p0 }
   0x8   :  { %114 = shalt.err (!%p111_p2)
}
   0x9   :  { %s115_s18 = scalar_lea.vmem %s16_s10, 256  ;;  %p120_p4 = scmp.lt.s32.totalorder %s16_s10, %s16_s10 }
   0xa   :  { %p116_p3 = scmp.ne.s32.totalorder %s16_s10, %s115_s18  ;;  %p121_p5 = scmp.lt.s32.totalorder %s115_s18, %s115_s18 }
   0xc   :  { %p122_p6 = por %p121_p5, %p120_p4 }
   0xe   :  { %p123_p7 = pnand %p122_p6, %p116_p3 }
  0x10   :  { %126 = shalt.err (!%p123_p7)
}
  0x11   :  { %s178_s19 = smov 128   ;;  %s179_s20 = smov 8  }
  0x12   :  { %21 = dma.hbm_to_vmem [thread:$0]  %s233_s0, 256, %s16_s10, [#allocation3], %s178_s19, %s178_s19, %s179_s20  }
  0x13   :  { %s180_s23 = smov [#allocation5]   ;;  %s127_s27 = scalar_lea.hbm %s234_s1, 256 }
  0x14   :  { %s27_s24 = sshll.u32 %s180_s23, 4  ;;  %p128_p8 = scmp.ne.s32.totalorder %s234_s1, %s127_s27  ;;  %s28_s24 = int_to_ptr.vmem [resolvable:$true] %s27_s24 }
  0x15   :  { %p131_p9 = scmp.lt.u32.totalorder %s127_s27, %s234_s1 }
  0x17   :  { %p133_p10 = pnand %p131_p9, %p128_p8 }
  0x19   :  { %136 = shalt.err (!%p133_p10)
}
  0x1a   :  { %s137_s4 = scalar_lea.vmem %s28_s24, 256  ;;  %p142_p12 = scmp.lt.s32.totalorder %s28_s24, %s28_s24 }
  0x1b   :  { %p138_p11 = scmp.ne.s32.totalorder %s28_s24, %s137_s4  ;;  %p143_p13 = scmp.lt.s32.totalorder %s137_s4, %s137_s4 }
  0x1d   :  { %p144_p0 = por %p143_p13, %p142_p12 }
  0x1f   :  { %p145_p1 = pnand %p144_p0, %p138_p11 }
  0x21   :  { %148 = shalt.err (!%p145_p1)
}
  0x22   :  { %33 = dma.hbm_to_vmem [thread:$0]  %s234_s1, 256, %s28_s24, [#allocation6], %s178_s19, %s178_s19, %s179_s20  }
  0x23   :  { %171 = dma.done.wait [#allocation3], 256  }
  0x24   :  { %172 = vsyncadd [#allocation3], 4294967040 }
  0x25   :  { %173 = dma.done.wait [#allocation6], 256  }
  0x26   :  { %174 = vsyncadd [#allocation6], 4294967040  ;;  %v40_v0 = vld [vmem:[#allocation2] sm:$0xff]  ;;  %v41_v1 = vld [vmem:[#allocation2 + $0x8] sm:$0xff]  ;;  %s181_s1 = smov [#allocation7]  }
  0x27   :  { %v42_v2 = vld [vmem:[#allocation5] sm:$0xff]  ;;  %v43_v3 = vld [vmem:[#allocation5 + $0x8] sm:$0xff]  ;;  %s84_s6 = sshll.u32 %s181_s1, 4  ;;  %s85_s6 = int_to_ptr.vmem [resolvable:$true] %s84_s6 }
  0x28   :  { %v44_v4 = vsub.f32 %v42_v2, %v40_v0  ;;  %v45_v5 = vsub.f32 %v43_v3, %v41_v1  ;;  %s149_s7 = scalar_lea.vmem %s85_s6, 128  ;;  %p154_p3 = scmp.lt.s32.totalorder %s85_s6, %s85_s6 }
  0x29   :  { %p150_p2 = scmp.ne.s32.totalorder %s85_s6, %s149_s7  ;;  %p155_p4 = scmp.lt.s32.totalorder %s149_s7, %s149_s7 }
  0x2a   :  { %v46_v6 = vand.u32 2147483647, %v44_v4  ;;  %v47_v7 = vand.u32 2147483647, %v45_v5 }
  0x2b   :  { %p156_p5 = por %p155_p4, %p154_p3 }
  0x2c   :  { %v50_v8 = vmul.f32 0.5, %v46_v6  ;;  %v51_v9 = vmul.f32 0.5, %v47_v7  ;;  %v94_v24 = vadd.f32 7.917595, %v46_v6  ;;  %vm48_vm2 = vcmp.lt.f32.partialorder %v46_v6, 10.0 }
  0x2d   :  { %v95_v26 = vadd.f32 7.917595, %v47_v7  ;;  %vm49_vm3 = vcmp.lt.f32.partialorder %v47_v7, 10.0  ;;  %p157_p6 = pnand %p156_p5, %p150_p2 }
  0x2e   :  { %v52_v10 = vadd.f32 1.0, %v50_v8  ;;  %v61_v11 = vadd.f32 1.0, %v51_v9  ;;  %v55_v12 = vmul.f32 -0.5, %v50_v8  ;;  %v64_v13 = vmul.f32 -0.5, %v51_v9 }
  0x2f   :  { %v58_v15 = vand.u32 2147483647, %v50_v8  ;;  %v67_v17 = vand.u32 2147483647, %v51_v9 }
  0x30   :  { %101 = vlog2.f32 %v52_v10  ;;  %v56_v14 = vadd.f32 1.0, %v55_v12  ;;  %v65_v16 = vadd.f32 1.0, %v64_v13 }
  0x31   :  { %103 = vlog2.f32 %v61_v11  ;;  %vm59_vm0 = vcmp.lt.f32.partialorder %v58_v15, 0.0004427343  ;;  %vm68_vm1 = vcmp.lt.f32.partialorder %v67_v17, 0.0004427343 }
  0x32   :  { %v57_v18 = vmul.f32 %v56_v14, %v50_v8  ;;  %v66_v20 = vmul.f32 %v65_v16, %v51_v9 }
  0x3a   :  { %v102_v19 = vpop.eup %101 }
  0x3b   :  { %v104_v21 = vpop.eup %103  ;;  %v54_v22 = vmul.f32 0.6931472, %v102_v19 }
  0x3c   :  { %v63_v23 = vmul.f32 0.6931472, %v104_v21 }
  0x3d   :  { %v60_v25 = vsel %vm59_vm0, %v57_v18, %v54_v22 }
  0x3e   :  { %v69_v27 = vsel %vm68_vm1, %v66_v20, %v63_v23  ;;  %v70_v28 = vmul.f32 10.0, %v60_v25 }
  0x3f   :  { %v71_v29 = vmul.f32 10.0, %v69_v27 }
  0x40   :  { %v74_v30 = vsel %vm48_vm2, %v70_v28, %v94_v24 }
  0x41   :  { %v75_v31 = vsel %vm49_vm3, %v71_v29, %v95_v26 }
  0x42   :  { %v76_v32 = vadd.f32 %v75_v31, %v74_v30 }
  0x44   :  { %77 = vst [vmem:[#allocation7] sm:$0xff] %v76_v32 }
  0x45   :  { %160 = shalt.err (!%p157_p6)
}
  0x46   :  { %s161_s10 = scalar_lea.hbm %s235_s2, 128 }
  0x47   :  { %p162_p7 = scmp.ne.s32.totalorder %s235_s2, %s161_s10  ;;  %p165_p8 = scmp.lt.u32.totalorder %s161_s10, %s235_s2 }
  0x49   :  { %p167_p9 = pnand %p165_p8, %p162_p7 }
  0x4b   :  { %170 = shalt.err (!%p167_p9)
}
  0x4c   :  { %87 = dma.vmem_to_hbm [thread:$0]  %s85_s6, 128, %s235_s2, [#allocation4]  }
  0x4d   :  { %175 = dma.done.wait [#allocation4], 128  }
  0x4e   :  { %176 = vsyncadd [#allocation4], 4294967168 }
  0x4f   :  { %91 = vsyncpa [#allocation3], 1 }
  0x50   :  { %92 = vsyncpa [#allocation6], 1 }
  0x51   :  { %93 = vsyncpa [#allocation4], 1 }

</bundles_post_ra>
